<compile_context>
chip_gen: v5e
topology: v5e:2x2
jax: 0.10.0
libtpu: 0.0.40
codegen_flags: <defaults>
</compile_context>

<pallas_src>
import functools

import jax
import jax.numpy as jnp
from jax.experimental import pallas as pl
from jax.experimental.pallas import tpu as pltpu


def _conv3x3_relu_kernel(x_ref, w_ref, b_ref, o_ref, *, H, W, pad):
    """One grid step = one batch element.

    x_ref : (1, Cin, pad + H*W + pad)  flattened spatial axis with zero halo
    w_ref : (9, Cout, Cin)             per-tap weights, tap index t = kh*3 + kw
    b_ref : (Cout, 1)                  bias
    o_ref : (1, Cout, H*W)             lane-dense output tile
    """
    HW = H * W
    cin = x_ref.shape[1]
    cout = w_ref.shape[1]

    # Column-validity masks for the +/-1 horizontal taps (vertical out-of-range
    # positions land in the zero halo of the flattened axis automatically).
    col = jax.lax.broadcasted_iota(jnp.int32, (cin, HW), 1) % W
    mask_l = col >= 1          # reading column j-1 is valid
    mask_r = col <= W - 2      # reading column j+1 is valid

    # Accumulator initialized with the broadcast bias (saves a separate add);
    # broadcast is hoisted outside the tap loop.
    acc = jnp.broadcast_to(b_ref[...], (cout, HW)).astype(jnp.float32)

    # 3x3 taps: each is a lane-dense (Cout, Cin) x (Cin, H*W) MXU contraction.
    for kh in range(3):
        for kw in range(3):
            t = kh * 3 + kw
            s = (kh - 1) * W + (kw - 1)
            shifted = x_ref[0, :, pad + s:pad + s + HW]        # (Cin, HW)
            if kw == 0:
                shifted = jnp.where(mask_l, shifted, 0.0)
            elif kw == 2:
                shifted = jnp.where(mask_r, shifted, 0.0)
            acc = acc + jax.lax.dot_general(
                w_ref[t], shifted,
                dimension_numbers=(((1,), (0,)), ((), ())),
                preferred_element_type=jnp.float32,
            )

    o_ref[0] = jnp.maximum(acc, 0.0).astype(o_ref.dtype)


def mobile_adapter_forward(x_nchw, weight_oihw, bias):
    """Equivalent of: ReLU(Conv2d(Cin, Cout, 3, padding=1)(x)) for NCHW input."""
    N, Cin, H, W = x_nchw.shape
    Cout = weight_oihw.shape[0]
    HW = H * W
    pad = W + 1        # halo covers the largest flattened tap shift (W + 1)

    # Free reshape to the flattened NCHW layout + tiny zero halo along the
    # flattened spatial axis (so in-kernel row/col shifts are contiguous loads).
    x_flat = x_nchw.reshape(N, Cin, HW)
    x_halo = jnp.pad(x_flat, ((0, 0), (0, 0), (pad, pad)))

    # (Cout, Cin, 3, 3) -> (9, Cout, Cin): one (Cout, Cin) matrix per tap.
    w_taps = jnp.transpose(weight_oihw, (2, 3, 0, 1)).reshape(9, Cout, Cin)
    b2d = bias.reshape(Cout, 1)

    kernel = functools.partial(_conv3x3_relu_kernel, H=H, W=W, pad=pad)

    out_flat = pl.pallas_call(
        kernel,
        out_shape=jax.ShapeDtypeStruct((N, Cout, HW), x_nchw.dtype),
        grid_spec=pltpu.PrefetchScalarGridSpec(
            num_scalar_prefetch=0,
            grid=(N,),
            in_specs=[
                pl.BlockSpec((1, Cin, HW + 2 * pad), lambda n: (n, 0, 0)),
                pl.BlockSpec((9, Cout, Cin), lambda n: (0, 0, 0)),
                pl.BlockSpec((Cout, 1), lambda n: (0, 0)),
            ],
            out_specs=pl.BlockSpec((1, Cout, HW), lambda n: (n, 0, 0)),
        ),
        compiler_params=pltpu.CompilerParams(
            dimension_semantics=("parallel",),
        ),
    )(x_halo, w_taps, b2d)

    # Output is already NCHW; reshape of the flattened spatial axis is free.
    return out_flat.reshape(N, Cout, H, W)


def _reference(x_nchw, weight_oihw, bias):
    y = jax.lax.conv_general_dilated(
        x_nchw, weight_oihw,
        window_strides=(1, 1), padding="SAME",
        dimension_numbers=("NCHW", "OIHW", "NCHW"),
    )
    y = y + bias[None, :, None, None]
    return jnp.maximum(y, 0.0)


if __name__ == "__main__":
    # Small shapes consistent with the module (in1 -> out channels, 3x3, pad=1).
    N, Cin, Cout, H, W = 2, 4, 8, 16, 16

    key = jax.random.PRNGKey(0)
    kx, kwt, kb = jax.random.split(key, 3)
    x = jax.random.normal(kx, (N, Cin, H, W), dtype=jnp.float32)
    weight = jax.random.normal(kwt, (Cout, Cin, 3, 3), dtype=jnp.float32) * 0.1
    bias = jax.random.normal(kb, (Cout,), dtype=jnp.float32) * 0.1

    out = jax.block_until_ready(mobile_adapter_forward(x, weight, bias))
    ref = jax.block_until_ready(_reference(x, weight, bias))

    assert out.shape == (N, Cout, H, W)
    assert jnp.allclose(out, ref, atol=1e-5, rtol=1e-5), "mismatch vs reference conv"

    print("KERNEL_OK")
</pallas_src>

<mosaic_0001>
module attributes {stable_mosaic.version = 11 : i64} {
  func.func @_conv3x3_relu_kernel(%arg0: i32, %arg1: memref<1x4x290xf32, #tpu.memory_space<vmem>>, %arg2: memref<9x8x4xf32, #tpu.memory_space<vmem>>, %arg3: memref<8x1xf32, #tpu.memory_space<vmem>>, %arg4: memref<1x8x256xf32, #tpu.memory_space<vmem>>) attributes {dimension_semantics = [#tpu.dimension_semantics<parallel>], iteration_bounds = array<i64: 2>, scalar_prefetch = 0 : i64, scratch_operands = 0 : i64, tpu.core_type = #tpu.core_type<tc>, window_params = [{transform_indices = @transform_0, window_bounds = array<i64: 1, 4, 290>}, {pipeline_mode = #tpu.pipeline_mode<synchronous>, transform_indices = @transform_1, window_bounds = array<i64: 9, 8, 4>}, {pipeline_mode = #tpu.pipeline_mode<synchronous>, transform_indices = @transform_2, window_bounds = array<i64: 8, 1>}, {transform_indices = @transform_3, window_bounds = array<i64: 1, 8, 256>}]} {
    %0 = tpu.iota {dimensions = array<i32: 1>} : vector<4x256xi32>
    %c16_i32 = arith.constant 16 : i32
    %c0_i32 = arith.constant 0 : i32
    %1 = arith.cmpi eq, %c16_i32, %c0_i32 : i32
    %c1_i32 = arith.constant 1 : i32
    %2 = arith.select %1, %c1_i32, %c16_i32 : i32
    %3 = vector.broadcast %2 : i32 to vector<4x256xi32>
    %4 = arith.remsi %0, %3 : vector<4x256xi32>
    %c0_i32_0 = arith.constant 0 : i32
    %5 = vector.broadcast %c0_i32_0 : i32 to vector<4x256xi32>
    %6 = arith.cmpi ne, %4, %5 : vector<4x256xi32>
    %c0_i32_1 = arith.constant 0 : i32
    %7 = vector.broadcast %c0_i32_1 : i32 to vector<4x256xi32>
    %8 = arith.cmpi slt, %4, %7 : vector<4x256xi32>
    %c0_i32_2 = arith.constant 0 : i32
    %9 = arith.cmpi slt, %2, %c0_i32_2 : i32
    %10 = vector.broadcast %9 : i1 to vector<4x256xi1>
    %11 = vector.broadcast %10 : vector<4x256xi1> to vector<4x256xi1>
    %12 = arith.xori %8, %11 : vector<4x256xi1>
    %13 = arith.andi %12, %6 : vector<4x256xi1>
    %14 = vector.broadcast %2 : i32 to vector<4x256xi32>
    %15 = arith.addi %4, %14 : vector<4x256xi32>
    %16 = arith.select %13, %15, %4 : vector<4x256xi1>, vector<4x256xi32>
    %c1_i32_3 = arith.constant 1 : i32
    %17 = vector.broadcast %c1_i32_3 : i32 to vector<4x256xi32>
    %18 = arith.cmpi sge, %16, %17 : vector<4x256xi32>
    %c14_i32 = arith.constant 14 : i32
    %19 = vector.broadcast %c14_i32 : i32 to vector<4x256xi32>
    %20 = arith.cmpi sle, %16, %19 : vector<4x256xi32>
    %c0 = arith.constant 0 : index
    %c0_4 = arith.constant 0 : index
    %21 = vector.load %arg3[%c0, %c0_4] : memref<8x1xf32, #tpu.memory_space<vmem>>, vector<8x1xf32>
    %22 = vector.shape_cast %21 : vector<8x1xf32> to vector<8x1xf32>
    %23 = vector.broadcast %22 : vector<8x1xf32> to vector<8x256xf32>
    %c0_5 = arith.constant 0 : index
    %c0_6 = arith.constant 0 : index
    %c0_7 = arith.constant 0 : index
    %24 = vector.load %arg1[%c0_5, %c0_6, %c0_7] : memref<1x4x290xf32, #tpu.memory_space<vmem>>, vector<1x4x256xf32>
    %25 = vector.shape_cast %24 : vector<1x4x256xf32> to vector<4x256xf32>
    %cst = arith.constant 0.000000e+00 : f32
    %26 = vector.broadcast %cst : f32 to vector<4x256xf32>
    %27 = arith.select %18, %25, %26 : vector<4x256xi1>, vector<4x256xf32>
    %c0_8 = arith.constant 0 : index
    %c0_9 = arith.constant 0 : index
    %c0_10 = arith.constant 0 : index
    %28 = vector.load %arg2[%c0_8, %c0_9, %c0_10] : memref<9x8x4xf32, #tpu.memory_space<vmem>>, vector<1x8x4xf32>
    %29 = vector.shape_cast %28 : vector<1x8x4xf32> to vector<8x4xf32>
    %cst_11 = arith.constant dense<0.000000e+00> : vector<8x256xf32>
    %30 = tpu.matmul %29, %27, %cst_11 {dimension_numbers = #tpu.dot_dimension_numbers<[1], [0], [0], [1], [0, 0, 1, 1], [], []>} : vector<8x4xf32>, vector<4x256xf32>, vector<8x256xf32> -> vector<8x256xf32>
    %31 = arith.addf %23, %30 : vector<8x256xf32>
    %c0_12 = arith.constant 0 : index
    %c0_13 = arith.constant 0 : index
    %c1 = arith.constant 1 : index
    %32 = vector.load %arg1[%c0_12, %c0_13, %c1] : memref<1x4x290xf32, #tpu.memory_space<vmem>>, vector<1x4x256xf32>
    %33 = vector.shape_cast %32 : vector<1x4x256xf32> to vector<4x256xf32>
    %c1_14 = arith.constant 1 : index
    %c0_15 = arith.constant 0 : index
    %c0_16 = arith.constant 0 : index
    %34 = vector.load %arg2[%c1_14, %c0_15, %c0_16] : memref<9x8x4xf32, #tpu.memory_space<vmem>>, vector<1x8x4xf32>
    %35 = vector.shape_cast %34 : vector<1x8x4xf32> to vector<8x4xf32>
    %cst_17 = arith.constant dense<0.000000e+00> : vector<8x256xf32>
    %36 = tpu.matmul %35, %33, %cst_17 {dimension_numbers = #tpu.dot_dimension_numbers<[1], [0], [0], [1], [0, 0, 1, 1], [], []>} : vector<8x4xf32>, vector<4x256xf32>, vector<8x256xf32> -> vector<8x256xf32>
    %37 = arith.addf %31, %36 : vector<8x256xf32>
    %c0_18 = arith.constant 0 : index
    %c0_19 = arith.constant 0 : index
    %c2 = arith.constant 2 : index
    %38 = vector.load %arg1[%c0_18, %c0_19, %c2] : memref<1x4x290xf32, #tpu.memory_space<vmem>>, vector<1x4x256xf32>
    %39 = vector.shape_cast %38 : vector<1x4x256xf32> to vector<4x256xf32>
    %cst_20 = arith.constant 0.000000e+00 : f32
    %40 = vector.broadcast %cst_20 : f32 to vector<4x256xf32>
    %41 = arith.select %20, %39, %40 : vector<4x256xi1>, vector<4x256xf32>
    %c2_21 = arith.constant 2 : index
    %c0_22 = arith.constant 0 : index
    %c0_23 = arith.constant 0 : index
    %42 = vector.load %arg2[%c2_21, %c0_22, %c0_23] : memref<9x8x4xf32, #tpu.memory_space<vmem>>, vector<1x8x4xf32>
    %43 = vector.shape_cast %42 : vector<1x8x4xf32> to vector<8x4xf32>
    %cst_24 = arith.constant dense<0.000000e+00> : vector<8x256xf32>
    %44 = tpu.matmul %43, %41, %cst_24 {dimension_numbers = #tpu.dot_dimension_numbers<[1], [0], [0], [1], [0, 0, 1, 1], [], []>} : vector<8x4xf32>, vector<4x256xf32>, vector<8x256xf32> -> vector<8x256xf32>
    %45 = arith.addf %37, %44 : vector<8x256xf32>
    %c0_25 = arith.constant 0 : index
    %c0_26 = arith.constant 0 : index
    %c16 = arith.constant 16 : index
    %46 = vector.load %arg1[%c0_25, %c0_26, %c16] : memref<1x4x290xf32, #tpu.memory_space<vmem>>, vector<1x4x256xf32>
    %47 = vector.shape_cast %46 : vector<1x4x256xf32> to vector<4x256xf32>
    %cst_27 = arith.constant 0.000000e+00 : f32
    %48 = vector.broadcast %cst_27 : f32 to vector<4x256xf32>
    %49 = arith.select %18, %47, %48 : vector<4x256xi1>, vector<4x256xf32>
    %c3 = arith.constant 3 : index
    %c0_28 = arith.constant 0 : index
    %c0_29 = arith.constant 0 : index
    %50 = vector.load %arg2[%c3, %c0_28, %c0_29] : memref<9x8x4xf32, #tpu.memory_space<vmem>>, vector<1x8x4xf32>
    %51 = vector.shape_cast %50 : vector<1x8x4xf32> to vector<8x4xf32>
    %cst_30 = arith.constant dense<0.000000e+00> : vector<8x256xf32>
    %52 = tpu.matmul %51, %49, %cst_30 {dimension_numbers = #tpu.dot_dimension_numbers<[1], [0], [0], [1], [0, 0, 1, 1], [], []>} : vector<8x4xf32>, vector<4x256xf32>, vector<8x256xf32> -> vector<8x256xf32>
    %53 = arith.addf %45, %52 : vector<8x256xf32>
    %c0_31 = arith.constant 0 : index
    %c0_32 = arith.constant 0 : index
    %c17 = arith.constant 17 : index
    %54 = vector.load %arg1[%c0_31, %c0_32, %c17] : memref<1x4x290xf32, #tpu.memory_space<vmem>>, vector<1x4x256xf32>
    %55 = vector.shape_cast %54 : vector<1x4x256xf32> to vector<4x256xf32>
    %c4 = arith.constant 4 : index
    %c0_33 = arith.constant 0 : index
    %c0_34 = arith.constant 0 : index
    %56 = vector.load %arg2[%c4, %c0_33, %c0_34] : memref<9x8x4xf32, #tpu.memory_space<vmem>>, vector<1x8x4xf32>
    %57 = vector.shape_cast %56 : vector<1x8x4xf32> to vector<8x4xf32>
    %cst_35 = arith.constant dense<0.000000e+00> : vector<8x256xf32>
    %58 = tpu.matmul %57, %55, %cst_35 {dimension_numbers = #tpu.dot_dimension_numbers<[1], [0], [0], [1], [0, 0, 1, 1], [], []>} : vector<8x4xf32>, vector<4x256xf32>, vector<8x256xf32> -> vector<8x256xf32>
    %59 = arith.addf %53, %58 : vector<8x256xf32>
    %c0_36 = arith.constant 0 : index
    %c0_37 = arith.constant 0 : index
    %c18 = arith.constant 18 : index
    %60 = vector.load %arg1[%c0_36, %c0_37, %c18] : memref<1x4x290xf32, #tpu.memory_space<vmem>>, vector<1x4x256xf32>
    %61 = vector.shape_cast %60 : vector<1x4x256xf32> to vector<4x256xf32>
    %cst_38 = arith.constant 0.000000e+00 : f32
    %62 = vector.broadcast %cst_38 : f32 to vector<4x256xf32>
    %63 = arith.select %20, %61, %62 : vector<4x256xi1>, vector<4x256xf32>
    %c5 = arith.constant 5 : index
    %c0_39 = arith.constant 0 : index
    %c0_40 = arith.constant 0 : index
    %64 = vector.load %arg2[%c5, %c0_39, %c0_40] : memref<9x8x4xf32, #tpu.memory_space<vmem>>, vector<1x8x4xf32>
    %65 = vector.shape_cast %64 : vector<1x8x4xf32> to vector<8x4xf32>
    %cst_41 = arith.constant dense<0.000000e+00> : vector<8x256xf32>
    %66 = tpu.matmul %65, %63, %cst_41 {dimension_numbers = #tpu.dot_dimension_numbers<[1], [0], [0], [1], [0, 0, 1, 1], [], []>} : vector<8x4xf32>, vector<4x256xf32>, vector<8x256xf32> -> vector<8x256xf32>
    %67 = arith.addf %59, %66 : vector<8x256xf32>
    %c0_42 = arith.constant 0 : index
    %c0_43 = arith.constant 0 : index
    %c32 = arith.constant 32 : index
    %68 = vector.load %arg1[%c0_42, %c0_43, %c32] : memref<1x4x290xf32, #tpu.memory_space<vmem>>, vector<1x4x256xf32>
    %69 = vector.shape_cast %68 : vector<1x4x256xf32> to vector<4x256xf32>
    %cst_44 = arith.constant 0.000000e+00 : f32
    %70 = vector.broadcast %cst_44 : f32 to vector<4x256xf32>
    %71 = arith.select %18, %69, %70 : vector<4x256xi1>, vector<4x256xf32>
    %c6 = arith.constant 6 : index
    %c0_45 = arith.constant 0 : index
    %c0_46 = arith.constant 0 : index
    %72 = vector.load %arg2[%c6, %c0_45, %c0_46] : memref<9x8x4xf32, #tpu.memory_space<vmem>>, vector<1x8x4xf32>
    %73 = vector.shape_cast %72 : vector<1x8x4xf32> to vector<8x4xf32>
    %cst_47 = arith.constant dense<0.000000e+00> : vector<8x256xf32>
    %74 = tpu.matmul %73, %71, %cst_47 {dimension_numbers = #tpu.dot_dimension_numbers<[1], [0], [0], [1], [0, 0, 1, 1], [], []>} : vector<8x4xf32>, vector<4x256xf32>, vector<8x256xf32> -> vector<8x256xf32>
    %75 = arith.addf %67, %74 : vector<8x256xf32>
    %c0_48 = arith.constant 0 : index
    %c0_49 = arith.constant 0 : index
    %c33 = arith.constant 33 : index
    %76 = vector.load %arg1[%c0_48, %c0_49, %c33] : memref<1x4x290xf32, #tpu.memory_space<vmem>>, vector<1x4x256xf32>
    %77 = vector.shape_cast %76 : vector<1x4x256xf32> to vector<4x256xf32>
    %c7 = arith.constant 7 : index
    %c0_50 = arith.constant 0 : index
    %c0_51 = arith.constant 0 : index
    %78 = vector.load %arg2[%c7, %c0_50, %c0_51] : memref<9x8x4xf32, #tpu.memory_space<vmem>>, vector<1x8x4xf32>
    %79 = vector.shape_cast %78 : vector<1x8x4xf32> to vector<8x4xf32>
    %cst_52 = arith.constant dense<0.000000e+00> : vector<8x256xf32>
    %80 = tpu.matmul %79, %77, %cst_52 {dimension_numbers = #tpu.dot_dimension_numbers<[1], [0], [0], [1], [0, 0, 1, 1], [], []>} : vector<8x4xf32>, vector<4x256xf32>, vector<8x256xf32> -> vector<8x256xf32>
    %81 = arith.addf %75, %80 : vector<8x256xf32>
    %c0_53 = arith.constant 0 : index
    %c0_54 = arith.constant 0 : index
    %c34 = arith.constant 34 : index
    %82 = vector.load %arg1[%c0_53, %c0_54, %c34] : memref<1x4x290xf32, #tpu.memory_space<vmem>>, vector<1x4x256xf32>
    %83 = vector.shape_cast %82 : vector<1x4x256xf32> to vector<4x256xf32>
    %cst_55 = arith.constant 0.000000e+00 : f32
    %84 = vector.broadcast %cst_55 : f32 to vector<4x256xf32>
    %85 = arith.select %20, %83, %84 : vector<4x256xi1>, vector<4x256xf32>
    %c8 = arith.constant 8 : index
    %c0_56 = arith.constant 0 : index
    %c0_57 = arith.constant 0 : index
    %86 = vector.load %arg2[%c8, %c0_56, %c0_57] : memref<9x8x4xf32, #tpu.memory_space<vmem>>, vector<1x8x4xf32>
    %87 = vector.shape_cast %86 : vector<1x8x4xf32> to vector<8x4xf32>
    %cst_58 = arith.constant dense<0.000000e+00> : vector<8x256xf32>
    %88 = tpu.matmul %87, %85, %cst_58 {dimension_numbers = #tpu.dot_dimension_numbers<[1], [0], [0], [1], [0, 0, 1, 1], [], []>} : vector<8x4xf32>, vector<4x256xf32>, vector<8x256xf32> -> vector<8x256xf32>
    %89 = arith.addf %81, %88 : vector<8x256xf32>
    %cst_59 = arith.constant 0.000000e+00 : f32
    %90 = vector.broadcast %cst_59 : f32 to vector<8x256xf32>
    %91 = arith.maximumf %89, %90 : vector<8x256xf32>
    %c0_60 = arith.constant 0 : index
    %c0_61 = arith.constant 0 : index
    %c0_62 = arith.constant 0 : index
    %92 = vector.load %arg4[%c0_60, %c0_61, %c0_62] : memref<1x8x256xf32, #tpu.memory_space<vmem>>, vector<1x8x256xf32>
    %93 = vector.shape_cast %92 : vector<1x8x256xf32> to vector<8x256xf32>
    %94 = vector.shape_cast %91 : vector<8x256xf32> to vector<1x8x256xf32>
    tpu.vector_store %arg4[%c0_60, %c0_61, %c0_62], %94 {strides = array<i32>} : memref<1x8x256xf32, #tpu.memory_space<vmem>>, vector<1x8x256xf32>,
    return
  }
  func.func @transform_0(%arg0: i32) -> (i32, i32, i32) {
    %c0_i32 = arith.constant 0 : i32
    %c0_i32_0 = arith.constant 0 : i32
    %c0_i32_1 = arith.constant 0 : i32
    return %arg0, %c0_i32, %c0_i32_0 : i32, i32, i32
  }
  func.func @transform_1(%arg0: i32) -> (i32, i32, i32) {
    %c0_i32 = arith.constant 0 : i32
    %c0_i32_0 = arith.constant 0 : i32
    %c0_i32_1 = arith.constant 0 : i32
    %c0_i32_2 = arith.constant 0 : i32
    return %c0_i32, %c0_i32_0, %c0_i32_1 : i32, i32, i32
  }
  func.func @transform_2(%arg0: i32) -> (i32, i32) {
    %c0_i32 = arith.constant 0 : i32
    %c0_i32_0 = arith.constant 0 : i32
    %c0_i32_1 = arith.constant 0 : i32
    return %c0_i32, %c0_i32_0 : i32, i32
  }
  func.func @transform_3(%arg0: i32) -> (i32, i32, i32) {
    %c0_i32 = arith.constant 0 : i32
    %c0_i32_0 = arith.constant 0 : i32
    %c0_i32_1 = arith.constant 0 : i32
    return %arg0, %c0_i32, %c0_i32_0 : i32, i32, i32
  }
}

</mosaic_0001>

<bundles_post_ra>
// kernel: tpu_custom_call.1
= control target key start
LH: loop header
LB: loop body
LE: loop exit
PB: predicated region body
PF: predicated region fallthrough
CT: control target
= control target key end

     0   :  { %8 = vsyncpa [#allocation3], 0  ;;  %s1359_s0 = inlined_call_operand.vmem [shape: f32[2,4,290], index: 0, kind: input, shape index: {}]   ;;  %s1360_s1 = inlined_call_operand.vmem [shape: f32[9,8,4], index: 1, kind: input, shape index: {}]   ;;  %s1361_s2 = inlined_call_operand.vmem [shape: f32[8,1], index: 2, kind: input, shape index: {}]   ;;  %s1362_s3 = inlined_call_operand.hbm [shape: f32[2,8,256], index: 3, kind: output, shape index: {}]  }
   0x1   :  { %10 = vsyncpa [#allocation3 + $0x1], 0  ;;  %s1138_s12 = smov 0   ;;  %s1140_s13 = smov 0  }
   0x2   :  { %s1142_s14 = smov 0   ;;  %s1144_s15 = smov 0  }
   0x3 LB: > { %s1159_s16 = sadd.s32 4294967295, %s1107_s15   ;;  %s939_s17 = sadd.s32 4294967294, %s1107_s15   ;;  %s1107_s15 = sphi %s1144_s15, %s1376_s15   ;;  %s1103_s14 = sphi %s1142_s14, %s1375_s14   ;;  %s1099_s13 = sphi %s1140_s13, %s1374_s13   ;;  %s1095_s12 = sphi %s1138_s12, %s1373_s12  }
   0x4   : > { %s1163_s18 = sadd.s32 1, %s1107_s15   ;;  %s91_s19 = sadd.s32 1, %s1103_s14 }
   0x5   : > { %s88_s20 = ssub.s32 %s1107_s15, %s1163_s18  ;;  %p101_p0 = scmp.ne.s32.totalorder %s1103_s14, %s1099_s13 }
   0x6   : > { %p89_p1 = scmp.eq.s32.totalorder %s88_s20, 0  ;;  %p102_p2 = scmp.eq.s32.totalorder %s1159_s16, 1 }
   0x7   : > { %p107_p3 = scmp.ne.s32.totalorder %s1099_s13, %s1095_s12  ;;  %p108_p4 = scmp.eq.s32.totalorder %s939_s17, 1 }
   0x8   : > { %s1174_s21 = scalar_select %p89_p1, %s1103_s14, %s91_s19  }
   0x9   : > { %p1176_p5 = por %p102_p2, %p101_p0  ;;  %p1180_p6 = por %p108_p4, %p107_p3 }
   0xa   : > { %p942_p7 = scmp.ge.s32.totalorder %s1107_s15, 1  ;;  %p140_p8 = scmp.lt.s32.totalorder %s1107_s15, 3 }
   0xc   : > { %p141_p9 = pnand %p942_p7, %p140_p8 }
   0xd   : > { %p164_p10 = scmp.lt.s32.totalorder (!%p141_p9), %s1159_s16, 1  ;;  %s1109_s29 = smov (!%p141_p9), 127  }
   0xe   : > { %144 = sbr.rel (%p141_p9) target bundleno = 351 (0x15f), region = 32  ;;  %s1110_s30 = smov (!%p141_p9), 126  }
   0xf   : > { %s1111_s4 = smov (!%p141_p9), 112   ;;  %s1112_s5 = smov (!%p141_p9), 111  }
  0x10   : > { %s1113_s6 = smov (!%p141_p9), 110   ;;  %s1114_s7 = smov (!%p141_p9), 96  }
  0x11   : > { %s1115_s8 = smov (!%p141_p9), 95   ;;  %s1116_s9 = smov (!%p141_p9), 94  }
  0x12   : > { %s161_s17 = sand.u32 (!%p141_p9), 1, %s1099_s13   ;;  %s994_s20 = sshll.u32 (!%p141_p9), %s1159_s16, 4 }
  0x13   : > { %s165_s24 = scalar_select %p164_p10, %s1159_s16, 1  ;;  %v169_v35 = vlaneseq  ;;  %vm220_vm1 = vcmask 1043456   ;;  %vm355_vm3 = vcmask 1031168   ;;  %v215_v49 = vld [vmem:[%s1360_s1] sm:$0xff]  ;;  %vm216_vm5 = vcmask 31744   ;;  %v954_v50 = vld [vmem:[%s1360_s1 + $0x10] sm:$0xff] }
  0x14   : > { %vm287_vm6 = vcmask 1039360   ;;  %v1117_v54 = vmov 0   ;;  %v200_v55 = vld [vmem:[%s1361_s2] sm:$0xff]  ;;  %v949_v59 = vld [vmem:[%s1360_s1 + $0x8] sm:$0xff]  ;;  %vm431_vm8 = vcmask 916480   ;;  %vm509_vm9 = vcmask 908288   ;;  %s875_s26 = scalar_lea.hbm %s1362_s3, %s994_s20 }
  0x15   : > { %s995_s25 = smul.u32 12, %s165_s24  ;;  %v170_v36 = vand.u32 127, %v169_v35  ;;  %1044 = vset.pattern.permute.xlu0 %v1117_v54  ;;  %vm577_vm10 = vcmask 900096   ;;  %vm653_vm11 = vcmask 785408   ;;  %vm731_vm12 = vcmask 777216   ;;  %s943_s19 = sshll.u32 %s161_s17, 4 }
  0x16   : > { %vm799_vm13 = vcmask 769024   ;;  %s163_s27 = scalar_lea.vmem [#allocation2], %s943_s19  ;;  %s864_s16 = scalar_lea.sflag [#allocation3], %s161_s17 }
  0x17   : > { %s1191_s28 = scalar_lea.vmem %s1359_s0, %s995_s25  ;;  %v171_v37 = vadd.s32 128, %v170_v36  ;;  %v176_v41 = vand.u32 15, %v170_v36 }
  0x18   : > { %v270_v0 = vld [vmem:[%s1191_s28 + $0x8] sm:$0xf]  ;;  %v1195_v1 = vld [vmem:[%s1191_s28] sm:$0xff] }
  0x19   : > { %277 = vst [vmem:[#allocation1 + $0x10] ss:$2 sm:$0xff] %v270_v0  ;;  %v340_v2 = vld [vmem:[%s1191_s28 + $0x8] sm:$0xf]  ;;  %v183_v38 = vand.u32 15, %v171_v37  ;;  %vm1225_vm2 = vcmp.ge.s32.totalorder %v176_v41, 1 }
  0x1a   : > { %208 = vst [vmem:[#allocation1] ss:$2 sm:$0xff] %v1195_v1  ;;  %v416_v9 = vld [vmem:[%s1191_s28 + $0x8] sm:$0xf]  ;;  %vm1253_vm7 = vcmp.le.s32.totalorder %v176_v41, 14 }
  0x1b   : > { %v492_v10 = vld [vmem:[%s1191_s28 + $0x8] sm:$0xf]  ;;  %vm1217_vm0 = vcmp.ge.s32.totalorder %v183_v38, 1  ;;  %vm1233_vm4 = vcmp.le.s32.totalorder %v183_v38, 14 }
  0x1c   : > { %v562_v14 = vld [vmem:[%s1191_s28 + $0x8] sm:$0xf] }
  0x1d   : > { %v638_v18 = vld [vmem:[%s1191_s28 + $0x8] sm:$0xf] }
  0x1e   : > { %v714_v22 = vld [vmem:[%s1191_s28 + $0x8] sm:$0xf] }
  0x1f   : > { %v784_v26 = vld [vmem:[%s1191_s28 + $0x8] sm:$0xf]  ;;  %s877_s28 = sshll.u32 %s163_s27, 4  ;;  %s878_s28 = int_to_ptr.vmem [resolvable:$true] %s877_s28 }
  0x20   : > { %v280_v3 = vld.sshfl [vmem:[#allocation1 + $0x10] sm:$0xff pattern:$0x75316420] }
  0x21   : > { %285 = vrot.lane.b32.xlu1 %v280_v3, %s1109_s29  ;;  %345 = vst [vmem:[#allocation1 + $0x10] ss:$2 sm:$0xff] %v340_v2  ;;  %v1199_v4 = vld.sshfl [vmem:[#allocation1] sm:$0xff pattern:$0x75316420] }
  0x22   : > { %v1201_v5 = vld.sshfl [vmem:[#allocation1 + $0x8] sm:$0xff pattern:$0x75316420]  ;;  %v213_v44 = vsel %vm1225_vm2, %v1199_v4, 0.0 }
  0x23   : > { %275 = vst [vmem:[#allocation1] ss:$2 sm:$0xff] %v1195_v1  ;;  %v214_v40 = vsel %vm1217_vm0, %v1201_v5, 0.0  ;;  %945 = vmatpush.msk.msra.mxu0 %vm220_vm1, %v213_v44  ;;  %v959_v5 = vld [vmem:[%s1360_s1 + $0x18] sm:$0xff] }
  0x24   : > { %947 = vmatpush.msk.msra.mxu1 %vm220_vm1, %v214_v40  ;;  %946 = vmatmul.msk.f32.vlgmr.msra.gmra.mxu0 %vm216_vm5, %v215_v49  ;;  %v984_v40 = vld [vmem:[%s1360_s1 + $0x40] sm:$0xff] }
  0x25   : > { %948 = vmatmul.msk.f32.vlgmr.msra.gmra.mxu1 %vm216_vm5, %v215_v49 }
  0x28   : > { %v348_v6 = vld.sshfl [vmem:[#allocation1 + $0x10] sm:$0xff pattern:$0x75316420] }
  0x29   : > { %353 = vrot.lane.b32.xlu2 %v348_v6, %s1110_s30  ;;  %421 = vst [vmem:[#allocation1 + $0x10] ss:$2 sm:$0xff] %v416_v9 }
  0x2a   : > { %v278_v7 = vld.sshfl [vmem:[#allocation1] sm:$0xff pattern:$0x75316420]  ;;  %v279_v8 = vld.sshfl [vmem:[#allocation1 + $0x8] sm:$0xff pattern:$0x75316420] }
  0x2b   : > { %281 = vrot.lane.b32.xlu0 %v278_v7, %s1109_s29  ;;  %343 = vst [vmem:[#allocation1] ss:$2 sm:$0xff] %v1195_v1 }
  0x30   : > { %v424_v13 = vld.sshfl [vmem:[#allocation1 + $0x10] sm:$0xff pattern:$0x75316420] }
  0x31   : > { %499 = vst [vmem:[#allocation1 + $0x10] ss:$2 sm:$0xff] %v492_v10 }
  0x32   : > { %v346_v11 = vld.sshfl [vmem:[#allocation1] sm:$0xff pattern:$0x75316420]  ;;  %v347_v12 = vld.sshfl [vmem:[#allocation1 + $0x8] sm:$0xff pattern:$0x75316420] }
  0x33   : > { %283 = vrot.lane.b32.xlu0 %v279_v8, %s1109_s29  ;;  %349 = vrot.lane.b32.xlu1 %v346_v11, %s1110_s30  ;;  %419 = vst [vmem:[#allocation1] ss:$2 sm:$0xff] %v1195_v1  ;;  %v964_v11 = vld [vmem:[%s1360_s1 + $0x20] sm:$0xff]  ;;  %s879_s29 = sshll.u32 %s875_s26, 4  ;;  %s880_s29 = int_to_ptr.hbm [resolvable:$true] %s879_s29 }
  0x34   : > { %351 = vrot.lane.b32.xlu2 %v347_v12, %s1110_s30  ;;  %s1059_s30 = sshra.s32 %s880_s29, 4  ;;  %s1060_s30 = int_to_ptr.hbm [resolvable:$true] %s1059_s30 }
  0x35   : > { %p1066_p0 = scmp.lt.s32.totalorder %s1060_s30, %s1362_s3 }
  0x38   : > { %v502_v17 = vld.sshfl [vmem:[#allocation1 + $0x10] sm:$0xff pattern:$0x75316420] }
  0x39   : > { %567 = vst [vmem:[#allocation1 + $0x10] ss:$2 sm:$0xff] %v562_v14 }
  0x3a   : > { %v423_v15 = vld.sshfl [vmem:[#allocation1 + $0x8] sm:$0xff pattern:$0x75316420]  ;;  %v422_v16 = vld.sshfl [vmem:[#allocation1] sm:$0xff pattern:$0x75316420] }
  0x3b   : > { %427 = vrot.lane.b32.xlu1 %v423_v15, %s1111_s4  ;;  %425 = vrot.lane.b32.xlu0 %v422_v16, %s1111_s4  ;;  %497 = vst [vmem:[#allocation1] ss:$2 sm:$0xff] %v1195_v1 }
  0x3c   : > { %429 = vrot.lane.b32.xlu2 %v424_v13, %s1111_s4  ;;  %s1061_s4 = scalar_lea.hbm %s1060_s30, 16 }
  0x3d   : > { %p1062_p11 = scmp.ne.s32.totalorder %s1060_s30, %s1061_s4 }
  0x3f   : > { %p1063_p12 = pnand %p1062_p11, %p1176_p5 }
  0x40   : > { %v570_v21 = vld.sshfl [vmem:[#allocation1 + $0x10] sm:$0xff pattern:$0x75316420] }
  0x41   : > { %643 = vst [vmem:[#allocation1 + $0x10] ss:$2 sm:$0xff] %v638_v18  ;;  %v969_v18 = vld [vmem:[%s1360_s1 + $0x28] sm:$0xff]  ;;  %p1064_p13 = pneg %p1063_p12 }
  0x42   : > { %v501_v19 = vld.sshfl [vmem:[#allocation1 + $0x8] sm:$0xff pattern:$0x75316420]  ;;  %v500_v20 = vld.sshfl [vmem:[#allocation1] sm:$0xff pattern:$0x75316420] }
  0x43   : > { %505 = vrot.lane.b32.xlu1 %v501_v19, %s1112_s5  ;;  %503 = vrot.lane.b32.xlu0 %v500_v20, %s1112_s5  ;;  %565 = vst [vmem:[#allocation1] ss:$2 sm:$0xff] %v1195_v1 }
  0x44   : > { %507 = vrot.lane.b32.xlu2 %v502_v17, %s1112_s5 }
  0x48   : > { %v646_v25 = vld.sshfl [vmem:[#allocation1 + $0x10] sm:$0xff pattern:$0x75316420] }
  0x49   : > { %721 = vst [vmem:[#allocation1 + $0x10] ss:$2 sm:$0xff] %v714_v22 }
  0x4a   : > { %v569_v23 = vld.sshfl [vmem:[#allocation1 + $0x8] sm:$0xff pattern:$0x75316420]  ;;  %v568_v24 = vld.sshfl [vmem:[#allocation1] sm:$0xff pattern:$0x75316420] }
  0x4b   : > { %573 = vrot.lane.b32.xlu1 %v569_v23, %s1113_s6  ;;  %571 = vrot.lane.b32.xlu0 %v568_v24, %s1113_s6  ;;  %641 = vst [vmem:[#allocation1] ss:$2 sm:$0xff] %v1195_v1 }
  0x4c   : > { %575 = vrot.lane.b32.xlu2 %v570_v21, %s1113_s6 }
  0x50   : > { %v724_v29 = vld.sshfl [vmem:[#allocation1 + $0x10] sm:$0xff pattern:$0x75316420] }
  0x51   : > { %789 = vst [vmem:[#allocation1 + $0x10] ss:$2 sm:$0xff] %v784_v26  ;;  %v974_v26 = vld [vmem:[%s1360_s1 + $0x30] sm:$0xff] }
  0x52   : > { %v645_v27 = vld.sshfl [vmem:[#allocation1 + $0x8] sm:$0xff pattern:$0x75316420]  ;;  %v644_v28 = vld.sshfl [vmem:[#allocation1] sm:$0xff pattern:$0x75316420] }
  0x53   : > { %649 = vrot.lane.b32.xlu1 %v645_v27, %s1114_s7  ;;  %647 = vrot.lane.b32.xlu0 %v644_v28, %s1114_s7  ;;  %719 = vst [vmem:[#allocation1] ss:$2 sm:$0xff] %v1195_v1 }
  0x54   : > { %651 = vrot.lane.b32.xlu2 %v646_v25, %s1114_s7  ;;  %s1065_s7 = scalar_lea.hbm %s1362_s3, 32 }
  0x55   : > { %p1067_p1 = scmp.lt.s32.totalorder %s1065_s7, %s1061_s4 }
  0x57   : > { %p1068_p2 = por %p1067_p1, %p1066_p0 }
  0x58   : > { %v792_v32 = vld.sshfl [vmem:[#allocation1 + $0x10] sm:$0xff pattern:$0x75316420] }
  0x59   : > { %p1069_p3 = pnand %p1068_p2, %p1064_p13 }
  0x5a   : > { %v723_v30 = vld.sshfl [vmem:[#allocation1 + $0x8] sm:$0xff pattern:$0x75316420]  ;;  %v722_v31 = vld.sshfl [vmem:[#allocation1] sm:$0xff pattern:$0x75316420] }
  0x5b   : > { %727 = vrot.lane.b32.xlu1 %v723_v30, %s1115_s8  ;;  %725 = vrot.lane.b32.xlu0 %v722_v31, %s1115_s8  ;;  %787 = vst [vmem:[#allocation1] ss:$2 sm:$0xff] %v1195_v1 }
  0x5c   : > { %729 = vrot.lane.b32.xlu2 %v724_v29, %s1115_s8 }
  0x62   : > { %v791_v33 = vld.sshfl [vmem:[#allocation1 + $0x8] sm:$0xff pattern:$0x75316420]  ;;  %v790_v34 = vld.sshfl [vmem:[#allocation1] sm:$0xff pattern:$0x75316420] }
  0x63   : > { %795 = vrot.lane.b32.xlu1 %v791_v33, %s1116_s9  ;;  %793 = vrot.lane.b32.xlu0 %v790_v34, %s1116_s9 }
  0x64   : > { %797 = vrot.lane.b32.xlu2 %v792_v32, %s1116_s9  ;;  %v979_v32 = vld [vmem:[%s1360_s1 + $0x38] sm:$0xff] }
  0x6b   : > { %203 = vperm.xlu0 %1044, %v200_v55  }
  0x83   : > { %v354_v42 = vpop.permute.xlu2 %353 }
  0x8e   : > { %v352_v46 = vpop.permute.xlu2 %351 }
  0x8f   : > { %v357_v47 = vsel %vm355_vm3, %v352_v46, %v354_v42 }
  0x90   : > { %v361_v48 = vsel %vm1233_vm4, %v357_v47, 0.0 }
  0x91   : > { %957 = vmatpush.msk.msrb.mxu1 %vm220_vm1, %v361_v48 }
  0x92   : > { %958 = vmatmul.msk.f32.vlgmr.msrb.gmra.mxu1 %vm216_vm5, %v954_v50 }
  0x93   : > { %v286_v51 = vpop.permute.xlu1 %285 }
  0x96   : > { %v430_v53 = vpop.permute.xlu2 %429 }
  0x9d   : > { %v282_v52 = vpop.permute.xlu0 %281 }
  0x9e   : > { %v508_v0 = vpop.permute.xlu2 %507 }
  0xa1   : > { %v244_v43 = vpop.f32.mrf.mxu0 }
  0xa2   : > { %v264_v44 = vpop.f32.mrf.mxu1 }
  0xa5   : > { %v284_v57 = vpop.permute.xlu0 %283  ;;  %v350_v58 = vpop.permute.xlu1 %349 }
  0xa6   : > { %v356_v60 = vsel %vm355_vm3, %v350_v58, %v352_v46  ;;  %v288_v61 = vsel %vm287_vm6, %v282_v52, %v284_v57  ;;  %v289_v62 = vsel %vm287_vm6, %v284_v57, %v286_v51  ;;  %v576_v8 = vpop.permute.xlu2 %575 }
  0xa7   : > { %950 = vmatpush.msk.msra.mxu2 %vm220_vm1, %v288_v61  ;;  %952 = vmatpush.msk.msra.mxu3 %vm220_vm1, %v289_v62  ;;  %v360_v63 = vsel %vm1253_vm7, %v356_v60, 0.0 }
  0xa8   : > { %955 = vmatpush.msk.msrb.mxu0 %vm220_vm1, %v360_v63  ;;  %951 = vmatmul.msk.f32.vlgmr.msra.gmra.mxu2 %vm216_vm5, %v949_v59 }
  0xa9   : > { %953 = vmatmul.msk.f32.vlgmr.msra.gmra.mxu3 %vm216_vm5, %v949_v59  ;;  %956 = vmatmul.msk.f32.vlgmr.msrb.gmra.mxu0 %vm216_vm5, %v954_v50 }
  0xad   : > { %v428_v1 = vpop.permute.xlu1 %427  ;;  %v426_v2 = vpop.permute.xlu0 %425 }
  0xae   : > { %v433_v3 = vsel %vm431_vm8, %v428_v1, %v430_v53  ;;  %v432_v4 = vsel %vm431_vm8, %v426_v2, %v428_v1  ;;  %v652_v21 = vpop.permute.xlu2 %651 }
  0xaf   : > { %v436_v6 = vsel %vm1225_vm2, %v432_v4, 0.0  ;;  %v437_v7 = vsel %vm1217_vm0, %v433_v3, 0.0 }
  0xb0   : > { %960 = vmatpush.msk.msrb.mxu2 %vm220_vm1, %v436_v6  ;;  %962 = vmatpush.msk.msrb.mxu3 %vm220_vm1, %v437_v7 }
  0xb1   : > { %961 = vmatmul.msk.f32.vlgmr.msrb.gmra.mxu2 %vm216_vm5, %v959_v5  ;;  %963 = vmatmul.msk.f32.vlgmr.msrb.gmra.mxu3 %vm216_vm5, %v959_v5 }
  0xb5   : > { %v506_v9 = vpop.permute.xlu1 %505  ;;  %v504_v10 = vpop.permute.xlu0 %503 }
  0xb6   : > { %v511_v12 = vsel %vm509_vm9, %v506_v9, %v508_v0  ;;  %v510_v13 = vsel %vm509_vm9, %v504_v10, %v506_v9  ;;  %v730_v29 = vpop.permute.xlu2 %729 }
  0xb7   : > { %965 = vmatpush.msk.msra.mxu0 %vm220_vm1, %v510_v13  ;;  %967 = vmatpush.msk.msra.mxu1 %vm220_vm1, %v511_v12 }
  0xb8   : > { %966 = vmatmul.msk.f32.vlgmr.msra.gmra.mxu0 %vm216_vm5, %v964_v11  ;;  %968 = vmatmul.msk.f32.vlgmr.msra.gmra.mxu1 %vm216_vm5, %v964_v11 }
  0xbd   : > { %v574_v14 = vpop.permute.xlu1 %573  ;;  %v572_v15 = vpop.permute.xlu0 %571 }
  0xbe   : > { %v579_v16 = vsel %vm577_vm10, %v574_v14, %v576_v8  ;;  %v578_v17 = vsel %vm577_vm10, %v572_v15, %v574_v14  ;;  %v798_v35 = vpop.permute.xlu2 %797 }
  0xbf   : > { %v583_v19 = vsel %vm1233_vm4, %v579_v16, 0.0  ;;  %v582_v20 = vsel %vm1253_vm7, %v578_v17, 0.0 }
  0xc0   : > { %970 = vmatpush.msk.msra.mxu2 %vm220_vm1, %v582_v20  ;;  %972 = vmatpush.msk.msra.mxu3 %vm220_vm1, %v583_v19 }
  0xc1   : > { %971 = vmatmul.msk.f32.vlgmr.msra.gmra.mxu2 %vm216_vm5, %v969_v18  ;;  %973 = vmatmul.msk.f32.vlgmr.msra.gmra.mxu3 %vm216_vm5, %v969_v18 }
  0xc5   : > { %v650_v22 = vpop.permute.xlu1 %649  ;;  %v648_v23 = vpop.permute.xlu0 %647 }
  0xc6   : > { %v655_v24 = vsel %vm653_vm11, %v650_v22, %v652_v21  ;;  %v654_v25 = vsel %vm653_vm11, %v648_v23, %v650_v22 }
  0xc7   : > { %v659_v27 = vsel %vm1217_vm0, %v655_v24, 0.0  ;;  %v658_v28 = vsel %vm1225_vm2, %v654_v25, 0.0 }
  0xc8   : > { %975 = vmatpush.msk.msrb.mxu0 %vm220_vm1, %v658_v28  ;;  %977 = vmatpush.msk.msrb.mxu1 %vm220_vm1, %v659_v27 }
  0xc9   : > { %976 = vmatmul.msk.f32.vlgmr.msrb.gmra.mxu0 %vm216_vm5, %v974_v26  ;;  %978 = vmatmul.msk.f32.vlgmr.msrb.gmra.mxu1 %vm216_vm5, %v974_v26 }
  0xcd   : > { %v728_v30 = vpop.permute.xlu1 %727  ;;  %v726_v31 = vpop.permute.xlu0 %725 }
  0xce   : > { %v733_v33 = vsel %vm731_vm12, %v728_v30, %v730_v29  ;;  %v732_v34 = vsel %vm731_vm12, %v726_v31, %v728_v30 }
  0xcf   : > { %980 = vmatpush.msk.msrb.mxu2 %vm220_vm1, %v732_v34  ;;  %982 = vmatpush.msk.msrb.mxu3 %vm220_vm1, %v733_v33 }
  0xd0   : > { %981 = vmatmul.msk.f32.vlgmr.msrb.gmra.mxu2 %vm216_vm5, %v979_v32  ;;  %983 = vmatmul.msk.f32.vlgmr.msrb.gmra.mxu3 %vm216_vm5, %v979_v32 }
  0xd5   : > { %v796_v36 = vpop.permute.xlu1 %795  ;;  %v794_v37 = vpop.permute.xlu0 %793 }
  0xd6   : > { %v801_v38 = vsel %vm799_vm13, %v796_v36, %v798_v35  ;;  %v800_v39 = vsel %vm799_vm13, %v794_v37, %v796_v36 }
  0xd7   : > { %v805_v41 = vsel %vm1233_vm4, %v801_v38, 0.0  ;;  %v804_v42 = vsel %vm1253_vm7, %v800_v39, 0.0 }
  0xd8   : > { %985 = vmatpush.msk.msra.mxu0 %vm220_vm1, %v804_v42  ;;  %987 = vmatpush.msk.msra.mxu1 %vm220_vm1, %v805_v41 }
  0xd9   : > { %986 = vmatmul.msk.f32.vlgmr.msra.gmra.mxu0 %vm216_vm5, %v984_v40  ;;  %988 = vmatmul.msk.f32.vlgmr.msra.gmra.mxu1 %vm216_vm5, %v984_v40 }
  0xdd   : > { %v204_v48 = vpop.permute.xlu0 %203 }
  0xde   : > { %v267_v45 = vadd.f32 %v244_v43, %v204_v48  ;;  %v268_v51 = vadd.f32 %v264_v44, %v204_v48 }
 0x10f   : > { %v410_v50 = vpop.f32.mrf.mxu1 }
 0x126   : > { %v390_v49 = vpop.f32.mrf.mxu0 }
 0x12b   : > { %v314_v46 = vpop.f32.mrf.mxu2 }
 0x12c   : > { %v334_v47 = vpop.f32.mrf.mxu3  ;;  %v337_v52 = vadd.f32 %v314_v46, %v267_v45 }
 0x12d   : > { %v338_v53 = vadd.f32 %v334_v47, %v268_v51 }
 0x12e   : > { %v413_v56 = vadd.f32 %v390_v49, %v337_v52 }
 0x12f   : > { %v414_v57 = vadd.f32 %v410_v50, %v338_v53 }
 0x134   : > { %v466_v54 = vpop.f32.mrf.mxu2  ;;  %v486_v55 = vpop.f32.mrf.mxu3 }
 0x135   : > { %v536_v58 = vpop.f32.mrf.mxu0  ;;  %v556_v59 = vpop.f32.mrf.mxu1  ;;  %v489_v60 = vadd.f32 %v466_v54, %v413_v56  ;;  %v490_v61 = vadd.f32 %v486_v55, %v414_v57 }
 0x137   : > { %v559_v0 = vadd.f32 %v536_v58, %v489_v60  ;;  %v560_v1 = vadd.f32 %v556_v59, %v490_v61 }
 0x144   : > { %v612_v62 = vpop.f32.mrf.mxu2  ;;  %v632_v63 = vpop.f32.mrf.mxu3 }
 0x145   : > { %v635_v2 = vadd.f32 %v612_v62, %v559_v0  ;;  %v636_v3 = vadd.f32 %v632_v63, %v560_v1 }
 0x146   : > { %v688_v4 = vpop.f32.mrf.mxu0  ;;  %v708_v5 = vpop.f32.mrf.mxu1 }
 0x147   : > { %v711_v6 = vadd.f32 %v688_v4, %v635_v2  ;;  %v712_v7 = vadd.f32 %v708_v5, %v636_v3 }
 0x153   : > { %v758_v8 = vpop.f32.mrf.mxu2  ;;  %v778_v9 = vpop.f32.mrf.mxu3 }
 0x154   : > { %v781_v10 = vadd.f32 %v758_v8, %v711_v6  ;;  %v782_v11 = vadd.f32 %v778_v9, %v712_v7 }
 0x156   : > { %v834_v12 = vpop.f32.mrf.mxu0  ;;  %v854_v13 = vpop.f32.mrf.mxu1 }
 0x157   : > { %v857_v14 = vadd.f32 %v834_v12, %v781_v10  ;;  %v858_v15 = vadd.f32 %v854_v13, %v782_v11 }
 0x159   : > { %v859_v16 = vmax.f32 %v857_v14, 0.0  ;;  %v860_v17 = vmax.f32 %v858_v15, 0.0 }
 0x15b   : > { %861 = vst [vmem:[%s163_s27] sm:$0xff] %v859_v16 }
 0x15c   : > { %862 = vst [vmem:[%s163_s27 + $0x8] sm:$0xff] %v860_v17 }
 0x15d   : > { %1072 = shalt.err (!%p1069_p3)
}
 0x15e   : > { %996 = dma.vmem_to_hbm [thread:$0]  (%p1176_p5), %s878_s28, 256, %s880_s29, %s864_s16  }
 0x15f PF: > { %p1002_p4 = scmp.ge.s32.totalorder %s1107_s15, 2  ;;  %s891_s10 = sand.u32 1, %s1095_s12  }
 0x160   : > { %s892_s11 = scalar_lea.sflag [#allocation3], %s891_s10 }
 0x161   : > { %p999_p7 = pnand %p1002_p4, %p1180_p6 }
 0x163   : > { %p1000_p8 = pneg %p999_p7 }
 0x165   : > { %1090 = dma.done.wait (%p1000_p8), %s892_s11, 256  }
 0x166   : > { %1092 = vsyncadd (%p1000_p8), %s892_s11, 4294967040  ;;  %p13_p9 = scmp.ge.s32.totalorder %s1163_s18, 4   ;;  %s1373_s12 = smov %s1099_s13 }
 0x167   : > { %s1374_s13 = smov %s1103_s14  ;;  %s1375_s14 = smov %s1174_s21 }
 0x168   : > { %s1376_s15 = smov %s1163_s18  ;;  %15 = sbr.rel (!%p13_p9) target bundleno = 3 (0x3), region = 83 }
 0x16d   :  { %898 = vsyncpa [#allocation3], 1 }
 0x16e   :  { %900 = vsyncpa [#allocation3 + $0x1], 1 }

</bundles_post_ra>
